<compile_context>
chip_gen: v5e
topology: v5e:2x2
jax: 0.10.0
libtpu: 0.0.40
codegen_flags: <defaults>
</compile_context>

<pallas_src>
import functools

import jax
import jax.numpy as jnp
from jax.experimental import pallas as pl
from jax.experimental.pallas import tpu as pltpu


def fc_kernel(x_ref, bits_ref, w1_ref, b1_ref, w2_ref, b2_ref, out_ref, *,
              keep_threshold):
    # fc1 on the MXU: bf16 operands, f32 accumulation.  (B_t, D) @ (D, Hp)
    h = jnp.dot(x_ref[...].astype(jnp.bfloat16), w1_ref[...],
                preferred_element_type=jnp.float32) + b1_ref[...]

    # dropout(p, training=True): keep iff uniform >= p, via integer threshold
    # on raw uint32 bits.  The 1/(1-p) survivor scale is pre-folded into w2.
    keep = bits_ref[...] >= jnp.uint32(keep_threshold)
    h = jnp.where(keep, h, 0.0)

    # relu
    h = jnp.maximum(h, 0.0)

    # fc2 as a VPU multiply + cross-lane (XLU) reduction: (B_t, Hp) * (1, Hp)
    # summed over lanes, plus the SMEM scalar bias.
    out = jnp.sum(h * w2_ref[...], axis=-1, keepdims=True) + b2_ref[0]
    out_ref[...] = out.astype(out_ref.dtype)


def fc_forward(x, w1, b1, w2, b2, dropout_key, *, dprop, tile_b=1024):
    """x: (B, D) f32.  w1: (D, 50), b1: (50,), w2: (50, 1), b2: () — PyTorch-equivalent params."""
    B, D = x.shape
    H = w1.shape[1]
    Hp = ((H + 127) // 128) * 128  # lane-align the hidden dimension

    # --- pad / repack parameters (one-time, outside the kernel) ---
    w1p = jnp.zeros((D, Hp), jnp.bfloat16).at[:, :H].set(w1.astype(jnp.bfloat16))
    b1p = jnp.zeros((1, Hp), jnp.float32).at[:, :H].set(b1.reshape(1, H).astype(jnp.float32))
    scale = 1.0 / (1.0 - float(dprop))  # survivor scale folded into w2
    w2p = jnp.zeros((1, Hp), jnp.float32).at[:, :H].set(
        (w2.reshape(1, H).astype(jnp.float32)) * scale)
    b2s = jnp.asarray(b2, jnp.float32).reshape((1,))

    # --- batch tiling ---
    if B >= tile_b:
        tile = tile_b
    else:
        tile = ((B + 7) // 8) * 8          # sublane-align small batches
    B_pad = ((B + tile - 1) // tile) * tile
    if B_pad != B:
        x = jnp.pad(x, ((0, B_pad - B), (0, 0)))

    # Per-element dropout bits, generated once for the whole (padded) batch.
    bits = jax.random.bits(dropout_key, (B_pad, Hp), dtype=jnp.uint32)

    keep_threshold = min(max(int(round(float(dprop) * 4294967296.0)), 0), 4294967295)
    kernel = functools.partial(fc_kernel, keep_threshold=keep_threshold)

    out = pl.pallas_call(
        kernel,
        out_shape=jax.ShapeDtypeStruct((B_pad, 1), x.dtype),
        grid=(B_pad // tile,),
        in_specs=[
            pl.BlockSpec((tile, D), lambda i: (i, 0)),            # x tile
            pl.BlockSpec((tile, Hp), lambda i: (i, 0)),           # dropout bits tile
            pl.BlockSpec((D, Hp), lambda i: (0, 0)),              # w1 (VMEM-resident)
            pl.BlockSpec((1, Hp), lambda i: (0, 0)),              # b1 (VMEM-resident)
            pl.BlockSpec((1, Hp), lambda i: (0, 0)),              # w2 row, pre-scaled
            pl.BlockSpec(memory_space=pltpu.MemorySpace.SMEM),    # b2 scalar
        ],
        out_specs=pl.BlockSpec((tile, 1), lambda i: (i, 0)),
        compiler_params=pltpu.CompilerParams(
            dimension_semantics=("parallel",)),
    )(x, bits, w1p, b1p, w2p, b2s)

    return out[:B]


def init_fc_params(key, input_dim, hidden=50):
    """Deterministic init mimicking nn.Linear defaults (uniform +-1/sqrt(fan_in)).

    Weights stored transposed vs. PyTorch: w1 is (input_dim, hidden), w2 is (hidden, 1).
    """
    k1, k2, k3, k4 = jax.random.split(key, 4)
    bound1 = 1.0 / jnp.sqrt(input_dim)
    bound2 = 1.0 / jnp.sqrt(hidden)
    w1 = jax.random.uniform(k1, (input_dim, hidden), jnp.float32, -bound1, bound1)
    b1 = jax.random.uniform(k2, (hidden,), jnp.float32, -bound1, bound1)
    w2 = jax.random.uniform(k3, (hidden, 1), jnp.float32, -bound2, bound2)
    b2 = jax.random.uniform(k4, (), jnp.float32, -bound2, bound2)
    return w1, b1, w2, b2


if __name__ == "__main__":
    key = jax.random.PRNGKey(0)
    k_x, k_params, k_drop = jax.random.split(key, 3)

    batch = 8
    input_dim = 32
    dprop = 0.25

    x = jax.random.normal(k_x, (batch, input_dim), jnp.float32)
    w1, b1, w2, b2 = init_fc_params(k_params, input_dim)

    out = fc_forward(x, w1, b1, w2, b2, k_drop, dprop=dprop)
    out = jax.block_until_ready(out)

    assert out.shape == (batch, 1), out.shape
    assert out.dtype == jnp.float32, out.dtype
    print("KERNEL_OK")
</pallas_src>

<mosaic_0001>
module attributes {stable_mosaic.version = 11 : i64} {
  func.func @fc_kernel(%arg0: i32, %arg1: memref<8x32xf32, #tpu.memory_space<vmem>>, %arg2: memref<8x128xi32, #tpu.memory_space<vmem>>, %arg3: memref<32x128xbf16, #tpu.memory_space<vmem>>, %arg4: memref<1x128xf32, #tpu.memory_space<vmem>>, %arg5: memref<1x128xf32, #tpu.memory_space<vmem>>, %arg6: memref<1xf32, #tpu.memory_space<smem>>, %arg7: memref<8x1xf32, #tpu.memory_space<vmem>>) attributes {dimension_semantics = [#tpu.dimension_semantics<parallel>], iteration_bounds = array<i64: 1>, scalar_prefetch = 0 : i64, scratch_operands = 0 : i64, tpu.core_type = #tpu.core_type<tc>, window_params = [{transform_indices = @transform_0, window_bounds = array<i64: 8, 32>}, {transform_indices = @transform_1, window_bounds = array<i64: 8, 128>}, {pipeline_mode = #tpu.pipeline_mode<synchronous>, transform_indices = @transform_2, window_bounds = array<i64: 32, 128>}, {pipeline_mode = #tpu.pipeline_mode<synchronous>, transform_indices = @transform_3, window_bounds = array<i64: 1, 128>}, {pipeline_mode = #tpu.pipeline_mode<synchronous>, transform_indices = @transform_4, window_bounds = array<i64: 1, 128>}, {transform_indices = @transform_5, window_bounds = array<i64: 1>}, {transform_indices = @transform_6, window_bounds = array<i64: 8, 1>}]} {
    %c0 = arith.constant 0 : index
    %c0_0 = arith.constant 0 : index
    %0 = vector.load %arg1[%c0, %c0_0] : memref<8x32xf32, #tpu.memory_space<vmem>>, vector<8x32xf32>
    %1 = arith.truncf %0 : vector<8x32xf32> to vector<8x32xbf16>
    %c0_1 = arith.constant 0 : index
    %c0_2 = arith.constant 0 : index
    %2 = vector.load %arg3[%c0_1, %c0_2] : memref<32x128xbf16, #tpu.memory_space<vmem>>, vector<32x128xbf16>
    %cst = arith.constant dense<0.000000e+00> : vector<8x128xf32>
    %3 = tpu.matmul %1, %2, %cst {dimension_numbers = #tpu.dot_dimension_numbers<[1], [0], [0], [1], [0, 0, 1, 1], [], []>} : vector<8x32xbf16>, vector<32x128xbf16>, vector<8x128xf32> -> vector<8x128xf32>
    %c0_3 = arith.constant 0 : index
    %c0_4 = arith.constant 0 : index
    %4 = vector.load %arg4[%c0_3, %c0_4] : memref<1x128xf32, #tpu.memory_space<vmem>>, vector<1x128xf32>
    %5 = vector.broadcast %4 : vector<1x128xf32> to vector<8x128xf32>
    %6 = arith.addf %3, %5 : vector<8x128xf32>
    %c0_5 = arith.constant 0 : index
    %c0_6 = arith.constant 0 : index
    %7 = vector.load %arg2[%c0_5, %c0_6] : memref<8x128xi32, #tpu.memory_space<vmem>>, vector<8x128xi32>
    %c1073741824_i32 = arith.constant 1073741824 : i32
    %8 = vector.broadcast %c1073741824_i32 : i32 to vector<8x128xi32>
    %9 = arith.cmpi uge, %7, %8 : vector<8x128xi32>
    %cst_7 = arith.constant 0.000000e+00 : f32
    %10 = vector.broadcast %cst_7 : f32 to vector<8x128xf32>
    %11 = arith.select %9, %6, %10 : vector<8x128xi1>, vector<8x128xf32>
    %cst_8 = arith.constant 0.000000e+00 : f32
    %12 = vector.broadcast %cst_8 : f32 to vector<8x128xf32>
    %13 = arith.maximumf %11, %12 : vector<8x128xf32>
    %c0_9 = arith.constant 0 : index
    %c0_10 = arith.constant 0 : index
    %14 = vector.load %arg5[%c0_9, %c0_10] : memref<1x128xf32, #tpu.memory_space<vmem>>, vector<1x128xf32>
    %15 = vector.broadcast %14 : vector<1x128xf32> to vector<8x128xf32>
    %16 = arith.mulf %13, %15 : vector<8x128xf32>
    %cst_11 = arith.constant dense<0.000000e+00> : vector<8xf32>
    %17 = vector.multi_reduction <add>, %16, %cst_11 [1] : vector<8x128xf32> to vector<8xf32>
    %18 = vector.shape_cast %17 : vector<8xf32> to vector<8x1xf32>
    %c0_12 = arith.constant 0 : index
    %19 = memref.load %arg6[%c0_12] : memref<1xf32, #tpu.memory_space<smem>>
    %20 = vector.broadcast %19 : f32 to vector<8x1xf32>
    %21 = arith.addf %18, %20 : vector<8x1xf32>
    %c0_13 = arith.constant 0 : index
    %c0_14 = arith.constant 0 : index
    %22 = vector.load %arg7[%c0_13, %c0_14] : memref<8x1xf32, #tpu.memory_space<vmem>>, vector<8x1xf32>
    tpu.vector_store %arg7[%c0_13, %c0_14], %21 {strides = array<i32>} : memref<8x1xf32, #tpu.memory_space<vmem>>, vector<8x1xf32>,
    return
  }
  func.func @transform_0(%arg0: i32) -> (i32, i32) {
    %c0_i32 = arith.constant 0 : i32
    %c0_i32_0 = arith.constant 0 : i32
    return %arg0, %c0_i32 : i32, i32
  }
  func.func @transform_1(%arg0: i32) -> (i32, i32) {
    %c0_i32 = arith.constant 0 : i32
    %c0_i32_0 = arith.constant 0 : i32
    return %arg0, %c0_i32 : i32, i32
  }
  func.func @transform_2(%arg0: i32) -> (i32, i32) {
    %c0_i32 = arith.constant 0 : i32
    %c0_i32_0 = arith.constant 0 : i32
    %c0_i32_1 = arith.constant 0 : i32
    return %c0_i32, %c0_i32_0 : i32, i32
  }
  func.func @transform_3(%arg0: i32) -> (i32, i32) {
    %c0_i32 = arith.constant 0 : i32
    %c0_i32_0 = arith.constant 0 : i32
    %c0_i32_1 = arith.constant 0 : i32
    return %c0_i32, %c0_i32_0 : i32, i32
  }
  func.func @transform_4(%arg0: i32) -> (i32, i32) {
    %c0_i32 = arith.constant 0 : i32
    %c0_i32_0 = arith.constant 0 : i32
    %c0_i32_1 = arith.constant 0 : i32
    return %c0_i32, %c0_i32_0 : i32, i32
  }
  func.func @transform_5(%arg0: i32) -> i32 {
    %c0_i32 = arith.constant 0 : i32
    %c0_i32_0 = arith.constant 0 : i32
    return %c0_i32 : i32
  }
  func.func @transform_6(%arg0: i32) -> (i32, i32) {
    %c0_i32 = arith.constant 0 : i32
    %c0_i32_0 = arith.constant 0 : i32
    return %arg0, %c0_i32 : i32, i32
  }
}

</mosaic_0001>

<bundles_post_ra>
// kernel: tpu_custom_call.1
= control target key start
LH: loop header
LB: loop body
LE: loop exit
PB: predicated region body
PF: predicated region fallthrough
CT: control target
= control target key end

     0   :  { %12 = vsyncpa [#allocation4], 0  ;;  %s287_s0 = inlined_call_operand.hbm [shape: f32[8,32], index: 0, kind: input, shape index: {}]   ;;  %s288_s1 = inlined_call_operand.hbm [shape: u32[8,128], index: 1, kind: input, shape index: {}]   ;;  %s289_s2 = inlined_call_operand.hbm [shape: bf16[32,128], index: 2, kind: input, shape index: {}]   ;;  %s290_s3 = inlined_call_operand.vmem [shape: f32[1,128], index: 3, kind: input, shape index: {}]   ;;  %s291_s4 = inlined_call_operand.vmem [shape: f32[1,128], index: 4, kind: input, shape index: {}]   ;;  %s292_s5 = inlined_call_operand.<no memory space> [shape: f32[1], index: 5, kind: input, shape index: {}]   ;;  %s293_s6 = inlined_call_operand.vmem [shape: f32[8,1], index: 6, kind: output, shape index: {}]  }
   0x1   :  { %13 = vsyncpa [#allocation6], 0  ;;  %s30_s23 = sshll.u32 %s288_s1, 4  ;;  %s226_s24 = smov [#allocation5]   ;;  %s31_s23 = int_to_ptr.hbm [resolvable:$true] %s30_s23 }
   0x2   :  { %s32_s25 = sshll.u32 %s226_s24, 4  ;;  %s19_s28 = sshll.u32 %s287_s0, 4  ;;  %s33_s25 = int_to_ptr.vmem [resolvable:$true] %s32_s25  ;;  %s20_s28 = int_to_ptr.hbm [resolvable:$true] %s19_s28 }
   0x3   :  { %35 = dma.hbm_to_vmem [thread:$0]  %s31_s23, 128, %s33_s25, [#allocation6]  }
   0x4   :  { %s227_s29 = smov [#allocation3]   ;;  %s40_s9 = sshll.u32 %s289_s2, 4  ;;  %s41_s9 = int_to_ptr.hbm [resolvable:$true] %s40_s9 }
   0x5   :  { %s21_s30 = sshll.u32 %s227_s29, 4  ;;  %s228_s1 = smov [#allocation7]   ;;  %s22_s30 = int_to_ptr.vmem [resolvable:$true] %s21_s30 }
   0x6   :  { %24 = dma.hbm_to_vmem [thread:$0]  %s20_s28, 128, %s22_s30, [#allocation4]  }
   0x7   :  { %s42_s10 = sshll.u32 %s228_s1, 4  ;;  %s229_s11 = smov 64   ;;  %s43_s10 = int_to_ptr.vmem [resolvable:$true] %s42_s10 }
   0x8   :  { %s230_s12 = smov 4  }
   0x9   :  { %48 = dma.hbm_to_vmem [thread:$0]  %s41_s9, 256, %s43_s10, [#allocation6], %s229_s11, %s229_s11, %s230_s12  }
   0xa   :  { %222 = dma.done.wait [#allocation4], 128  }
   0xb   :  { %223 = vsyncadd [#allocation4], 4294967168 }
   0xc   :  { %224 = dma.done.wait [#allocation6], 384  }
   0xd   :  { %225 = vsyncadd [#allocation6], 4294966912  ;;  %v142_v0 = vld [vmem:[#allocation7 + $0x8] sm:$0xff]  ;;  %v141_v1 = vld [vmem:[#allocation7] sm:$0xff]  ;;  %vm90_vm0 = vcmask 261120   ;;  %v121_v14 = vstv %s292_s5  ;;  %vm123_vm2 = vcmask 7168  }
   0xe   :  { %100 = vmatpush.bf16.msra.mxu0 %v142_v0  ;;  %v68_v2 = vld [vmem:[#allocation3] sm:$0xff]  ;;  %v107_v4 = vld [vmem:[#allocation5] sm:$0xff] }
   0xf   :  { %v69_v3 = vpack.c.bf16 %v68_v2, %v68_v2  ;;  %v140_v5 = vxor.u32 2147483648, %v107_v4  ;;  %v148_v6 = vld [vmem:[%s290_s3] ss:$0 sm:$0xff] }
  0x10   :  { %v149_v9 = vld [vmem:[%s291_s4] ss:$0 sm:$0xff] }
  0x11   :  { %vm110_vm1 = vcmp.ge.s32.totalorder %v140_v5, 3221225472 }
  0x12   :  { %101 = vmatpush.bf16.msra.mxu0 %v141_v1 }
  0x15   :  { %139 = vmatmul.msk.bf16.vlgmr.msra.gmra.mxu0 %vm90_vm0, %v69_v3 }
  0x92   :  { %v103_v7 = vpop.f32.mrf.mxu0 }
  0x93   :  { %v104_v8 = vadd.f32 %v148_v6, %v103_v7 }
  0x95   :  { %v111_v10 = vsel %vm110_vm1, %v104_v8, 0.0 }
  0x96   :  { %v112_v11 = vmax.f32 %v111_v10, 0.0 }
  0x98   :  { %v117_v12 = vmul.f32 %v149_v9, %v112_v11 }
  0x9a   :  { %v105_v13 = vpop.f32.mrf.mxu0  ;;  %118 = vadd.xlane.f32.xlu0 %v117_v12 }
 0x10d   :  { %v119_v15 = vpop.xlane.xlu0 %118 }
 0x10e   :  { %v122_v16 = vadd.f32 %v121_v14, %v119_v15 }
 0x110   :  { %124 = vst.msk [vmem:[%s293_s6] sm:$0xff] %vm123_vm2, %v122_v16 }
 0x111   :  { %129 = vsyncpa [#allocation4], 1 }
 0x112   :  { %130 = vsyncpa [#allocation6], 1 }

</bundles_post_ra>
